<compile_context>
chip_gen: v7x
topology: tpu7x:2x2x1
jax: 0.10.0
libtpu: 0.0.40
codegen_flags: <defaults>
</compile_context>

<pallas_src>
import functools

import jax
import jax.numpy as jnp
from jax.experimental import pallas as pl
from jax.experimental.pallas import tpu as pltpu

HIDDEN_SIZE = 2
INPUT_SIZE = 5
NUM_CLASSES = 3
NUM_LAYERS = 1
SEQ_LEN = 8
BATCH = 2


def _lstm_class_kernel(d_ref, out_ref, *, B, T, I, H, C):
    """LSTM recurrence + fc_2 + softmax. Single TC, no MXU, one input DMA.

    d_ref : (T*B + I + 2H + 2, W) f32, W = max(4H, C, I):
              rows [0 : T*B]                 x, TIME-MAJOR (row = t*B + b),
                                             lanes [0:I] valid, rest zero
              rows [T*B : T*B+I]             W_ih^T  (I, 4H)  (g-cols x2)
              rows [T*B+I : T*B+I+H]         W_hh^T  (H, 4H)  (g-cols x2)
              row  [T*B+I+H]                 b_ih + b_hh      (g-cols x2)
              rows [.. : ..+H]               W_fc2^T (H, C)   (lane-padded)
              row  [last]                    b_fc2   (1, C)   (lane-padded)
    out_ref: (B, C) f32 softmax probabilities.
    """
    G = 4 * H
    TB = T * B
    off_wih = TB
    off_whh = TB + I
    off_bias = TB + I + H
    off_wfc = off_bias + 1
    off_bfc = off_wfc + H

    x = d_ref[0:TB, :]                                    # (TB, W), pad lanes are 0

    # Hoisted one-time broadcasts of single parameter rows (prologue, off the
    # serial critical path).
    wih_rows = [
        jnp.broadcast_to(d_ref[off_wih + k:off_wih + k + 1, 0:G], (TB, G))
        for k in range(I)
    ]
    bias_tb = jnp.broadcast_to(d_ref[off_bias:off_bias + 1, 0:G], (TB, G))
    whh_rows = [
        jnp.broadcast_to(d_ref[off_whh + k:off_whh + k + 1, 0:G], (B, G))
        for k in range(H)
    ]
    wfc_rows = [
        jnp.broadcast_to(d_ref[off_wfc + k:off_wfc + k + 1, 0:C], (B, C))
        for k in range(H)
    ]
    bfc = jnp.broadcast_to(d_ref[off_bfc:off_bfc + 1, 0:C], (B, C))

    # ---- Input projection hoisted out of the recurrence: I broadcast-FMAs
    # on the VPU (no MXU push/pop latency for a (16,5)x(5,8) matmul). ----
    gates_x = bias_tb + x[:, 0:1] * wih_rows[0]
    for k in range(1, I):
        gates_x = gates_x + x[:, k:k + 1] * wih_rows[k]    # (TB, 4H)

    # ---- Serial recurrence, fully unrolled; h @ W_hh done as VPU FMAs. ----
    h = jnp.zeros((B, H), dtype=jnp.float32)
    c = jnp.zeros((B, H), dtype=jnp.float32)
    for t in range(T):
        gx = gates_x[t * B:(t + 1) * B, :]                 # contiguous (B, 4H)
        gh = h[:, 0:1] * whh_rows[0]
        for k in range(1, H):
            gh = gh + h[:, k:k + 1] * whh_rows[k]
        gates = gx + gh                                    # (B, 4H)

        # ONE whole-vreg transcendental per step: g-gate weights were
        # pre-scaled by 2, so tanh(a) = 2*sigmoid(2a) - 1 exactly.
        sig = jax.nn.sigmoid(gates)
        i_g = sig[:, 0 * H:1 * H]
        f_g = sig[:, 1 * H:2 * H]
        g_g = 2.0 * sig[:, 2 * H:3 * H] - 1.0
        o_g = sig[:, 3 * H:4 * H]

        c = f_g * c + i_g * g_g
        h = o_g * jnp.tanh(c)

    # ---- fc_2 as VPU FMAs (K = H), then softmax over classes. ----
    logits = bfc + h[:, 0:1] * wfc_rows[0]
    for k in range(1, H):
        logits = logits + h[:, k:k + 1] * wfc_rows[k]

    m = jnp.max(logits, axis=1, keepdims=True)
    e = jnp.exp(logits - m)
    out_ref[...] = e / jnp.sum(e, axis=1, keepdims=True)


def pack_lstm_class_params(w_ih, w_hh, b_ih, b_hh, w_fc2, b_fc2):
    """One-time (init) parameter packing into a single lane-padded f32 array.

    The g-gate (cell candidate) columns of W_ih, W_hh and the bias are scaled
    by 2 so the kernel can use the exact identity tanh(x) = 2*sigmoid(2x) - 1
    and evaluate a single sigmoid over the full (B, 4H) gate vector per step.
    """
    I = w_ih.shape[1]
    H = w_hh.shape[1]
    G = 4 * H
    C = w_fc2.shape[0]
    W = max(G, C, I)

    gate_scale = jnp.concatenate([
        jnp.ones((2 * H,), jnp.float32),
        jnp.full((H,), 2.0, jnp.float32),
        jnp.ones((H,), jnp.float32),
    ])                                                     # (4H,) [i, f, g, o]

    def _pad(a):
        a = a.astype(jnp.float32)
        return jnp.pad(a, ((0, 0), (0, W - a.shape[1])))

    return jnp.concatenate(
        [
            _pad(jnp.transpose(w_ih) * gate_scale[None, :]),      # (I, W)
            _pad(jnp.transpose(w_hh) * gate_scale[None, :]),      # (H, W)
            _pad(((b_ih + b_hh) * gate_scale).reshape(1, G)),     # (1, W)
            _pad(jnp.transpose(w_fc2)),                           # (H, W)
            _pad(b_fc2.reshape(1, C)),                            # (1, W)
        ],
        axis=0,
    )                                                             # (I+2H+2, W)


def lstm_class_forward(x_btI, packed_params, *, hidden_size, num_classes):
    """x_btI: (B, T, I) batch-first (as in PyTorch). Returns (B, num_classes)."""
    B, T, I = x_btI.shape
    H, C = hidden_size, num_classes
    G = 4 * H
    W = packed_params.shape[1]
    TB = T * B

    # Minimal per-call glue: time-major reorder + lane pad + one concat so the
    # kernel receives exactly ONE VMEM input (one DMA start/wait pair).
    x_tm = jnp.transpose(x_btI, (1, 0, 2)).reshape(TB, I).astype(jnp.float32)
    x_pad = jnp.pad(x_tm, ((0, 0), (0, W - I)))
    data = jnp.concatenate([x_pad, packed_params.astype(jnp.float32)], axis=0)

    kernel = functools.partial(_lstm_class_kernel, B=B, T=T, I=I, H=H, C=C)
    vmem = pl.BlockSpec(memory_space=pltpu.MemorySpace.VMEM)

    flops = 2 * TB * I * G + 2 * T * B * H * G + 10 * T * B * H + 2 * B * H * C
    transcendentals = T * B * (G + H) + B * C
    bytes_accessed = 4 * ((TB + I + 2 * H + 2) * W + B * C)

    return pl.pallas_call(
        kernel,
        out_shape=jax.ShapeDtypeStruct((B, C), jnp.float32),
        in_specs=[vmem],
        out_specs=vmem,
        cost_estimate=pl.CostEstimate(
            flops=flops,
            transcendentals=transcendentals,
            bytes_accessed=bytes_accessed,
        ),
    )(data)


def _reference_forward(x_btI, w_ih, w_hh, b_ih, b_hh, w_fc2, b_fc2):
    """Pure-JAX reference matching the PyTorch forward."""
    B, T, _ = x_btI.shape
    H = w_hh.shape[1]
    h = jnp.zeros((B, H), jnp.float32)
    c = jnp.zeros((B, H), jnp.float32)
    for t in range(T):
        g = x_btI[:, t, :] @ w_ih.T + h @ w_hh.T + b_ih + b_hh
        i_g = jax.nn.sigmoid(g[:, 0 * H:1 * H])
        f_g = jax.nn.sigmoid(g[:, 1 * H:2 * H])
        g_g = jnp.tanh(g[:, 2 * H:3 * H])
        o_g = jax.nn.sigmoid(g[:, 3 * H:4 * H])
        c = f_g * c + i_g * g_g
        h = o_g * jnp.tanh(c)
    logits = h @ w_fc2.T + b_fc2
    return jax.nn.softmax(logits, axis=1)


def _init_params(key):
    """Deterministic init matching PyTorch shapes (uniform(-1/sqrt(H), 1/sqrt(H)))."""
    H, I, C = HIDDEN_SIZE, INPUT_SIZE, NUM_CLASSES
    k = 1.0 / jnp.sqrt(jnp.float32(H))
    keys = jax.random.split(key, 6)
    w_ih = jax.random.uniform(keys[0], (4 * H, I), jnp.float32, -k, k)
    w_hh = jax.random.uniform(keys[1], (4 * H, H), jnp.float32, -k, k)
    b_ih = jax.random.uniform(keys[2], (4 * H,), jnp.float32, -k, k)
    b_hh = jax.random.uniform(keys[3], (4 * H,), jnp.float32, -k, k)
    w_fc2 = jax.random.uniform(keys[4], (C, H), jnp.float32, -k, k)
    b_fc2 = jax.random.uniform(keys[5], (C,), jnp.float32, -k, k)
    return w_ih, w_hh, b_ih, b_hh, w_fc2, b_fc2


if __name__ == "__main__":
    key = jax.random.PRNGKey(0)
    k_x, k_p = jax.random.split(key)

    # x: (batch=2, seq=8, input_size=5) — batch-first, as PyTorch forward expects.
    x = jax.random.normal(k_x, (BATCH, SEQ_LEN, INPUT_SIZE), dtype=jnp.float32)
    params = _init_params(k_p)

    # One-time packing (init path), hoisted out of the per-call hot path.
    packed = jax.block_until_ready(pack_lstm_class_params(*params))

    fwd = jax.jit(
        functools.partial(
            lstm_class_forward, hidden_size=HIDDEN_SIZE, num_classes=NUM_CLASSES
        )
    )
    out = jax.block_until_ready(fwd(x, packed))

    assert out.shape == (BATCH, NUM_CLASSES)
    # Softmax rows must sum to 1.
    assert bool(jnp.all(jnp.abs(jnp.sum(out, axis=1) - 1.0) < 1e-5))
    # Match the pure-JAX reference of the PyTorch forward.
    ref = _reference_forward(x, *params)
    assert bool(jnp.allclose(out, ref, rtol=1e-5, atol=1e-5))
    print("KERNEL_OK")
</pallas_src>

<mosaic_0001>
module attributes {stable_mosaic.version = 11 : i64} {
  func.func @_lstm_class_kernel(%arg0: memref<27x8xf32, #tpu.memory_space<vmem>>, %arg1: memref<2x3xf32, #tpu.memory_space<vmem>>) attributes {dimension_semantics = [], scalar_prefetch = 0 : i64, scratch_operands = 0 : i64, tpu.core_type = #tpu.core_type<tc>} {
    %c0 = arith.constant 0 : index
    %c0_0 = arith.constant 0 : index
    %0 = vector.load %arg0[%c0, %c0_0] : memref<27x8xf32, #tpu.memory_space<vmem>>, vector<16x8xf32>
    %c16 = arith.constant 16 : index
    %c0_1 = arith.constant 0 : index
    %1 = vector.load %arg0[%c16, %c0_1] : memref<27x8xf32, #tpu.memory_space<vmem>>, vector<1x8xf32>
    %2 = vector.shape_cast %1 : vector<1x8xf32> to vector<1x8xf32>
    %3 = vector.broadcast %2 : vector<1x8xf32> to vector<16x8xf32>
    %c17 = arith.constant 17 : index
    %c0_2 = arith.constant 0 : index
    %4 = vector.load %arg0[%c17, %c0_2] : memref<27x8xf32, #tpu.memory_space<vmem>>, vector<1x8xf32>
    %5 = vector.shape_cast %4 : vector<1x8xf32> to vector<1x8xf32>
    %6 = vector.broadcast %5 : vector<1x8xf32> to vector<16x8xf32>
    %c18 = arith.constant 18 : index
    %c0_3 = arith.constant 0 : index
    %7 = vector.load %arg0[%c18, %c0_3] : memref<27x8xf32, #tpu.memory_space<vmem>>, vector<1x8xf32>
    %8 = vector.shape_cast %7 : vector<1x8xf32> to vector<1x8xf32>
    %9 = vector.broadcast %8 : vector<1x8xf32> to vector<16x8xf32>
    %c19 = arith.constant 19 : index
    %c0_4 = arith.constant 0 : index
    %10 = vector.load %arg0[%c19, %c0_4] : memref<27x8xf32, #tpu.memory_space<vmem>>, vector<1x8xf32>
    %11 = vector.shape_cast %10 : vector<1x8xf32> to vector<1x8xf32>
    %12 = vector.broadcast %11 : vector<1x8xf32> to vector<16x8xf32>
    %c20 = arith.constant 20 : index
    %c0_5 = arith.constant 0 : index
    %13 = vector.load %arg0[%c20, %c0_5] : memref<27x8xf32, #tpu.memory_space<vmem>>, vector<1x8xf32>
    %14 = vector.shape_cast %13 : vector<1x8xf32> to vector<1x8xf32>
    %15 = vector.broadcast %14 : vector<1x8xf32> to vector<16x8xf32>
    %c23 = arith.constant 23 : index
    %c0_6 = arith.constant 0 : index
    %16 = vector.load %arg0[%c23, %c0_6] : memref<27x8xf32, #tpu.memory_space<vmem>>, vector<1x8xf32>
    %17 = vector.shape_cast %16 : vector<1x8xf32> to vector<1x8xf32>
    %18 = vector.broadcast %17 : vector<1x8xf32> to vector<16x8xf32>
    %c21 = arith.constant 21 : index
    %c0_7 = arith.constant 0 : index
    %19 = vector.load %arg0[%c21, %c0_7] : memref<27x8xf32, #tpu.memory_space<vmem>>, vector<1x8xf32>
    %20 = vector.shape_cast %19 : vector<1x8xf32> to vector<1x8xf32>
    %21 = vector.broadcast %20 : vector<1x8xf32> to vector<2x8xf32>
    %c22 = arith.constant 22 : index
    %c0_8 = arith.constant 0 : index
    %22 = vector.load %arg0[%c22, %c0_8] : memref<27x8xf32, #tpu.memory_space<vmem>>, vector<1x8xf32>
    %23 = vector.shape_cast %22 : vector<1x8xf32> to vector<1x8xf32>
    %24 = vector.broadcast %23 : vector<1x8xf32> to vector<2x8xf32>
    %c24 = arith.constant 24 : index
    %c0_9 = arith.constant 0 : index
    %25 = vector.load %arg0[%c24, %c0_9] : memref<27x8xf32, #tpu.memory_space<vmem>>, vector<1x3xf32>
    %26 = vector.shape_cast %25 : vector<1x3xf32> to vector<1x3xf32>
    %27 = vector.broadcast %26 : vector<1x3xf32> to vector<2x3xf32>
    %c25 = arith.constant 25 : index
    %c0_10 = arith.constant 0 : index
    %28 = vector.load %arg0[%c25, %c0_10] : memref<27x8xf32, #tpu.memory_space<vmem>>, vector<1x3xf32>
    %29 = vector.shape_cast %28 : vector<1x3xf32> to vector<1x3xf32>
    %30 = vector.broadcast %29 : vector<1x3xf32> to vector<2x3xf32>
    %c26 = arith.constant 26 : index
    %c0_11 = arith.constant 0 : index
    %31 = vector.load %arg0[%c26, %c0_11] : memref<27x8xf32, #tpu.memory_space<vmem>>, vector<1x3xf32>
    %32 = vector.shape_cast %31 : vector<1x3xf32> to vector<1x3xf32>
    %33 = vector.broadcast %32 : vector<1x3xf32> to vector<2x3xf32>
    %34 = vector.extract_strided_slice %0 {offsets = [0, 0], sizes = [16, 1], strides = [1, 1]} : vector<16x8xf32> to vector<16x1xf32>
    %35 = vector.broadcast %34 : vector<16x1xf32> to vector<16x8xf32>
    %36 = arith.mulf %35, %3 : vector<16x8xf32>
    %37 = arith.addf %18, %36 : vector<16x8xf32>
    %38 = vector.extract_strided_slice %0 {offsets = [0, 1], sizes = [16, 1], strides = [1, 1]} : vector<16x8xf32> to vector<16x1xf32>
    %39 = vector.broadcast %38 : vector<16x1xf32> to vector<16x8xf32>
    %40 = arith.mulf %39, %6 : vector<16x8xf32>
    %41 = arith.addf %37, %40 : vector<16x8xf32>
    %42 = vector.extract_strided_slice %0 {offsets = [0, 2], sizes = [16, 1], strides = [1, 1]} : vector<16x8xf32> to vector<16x1xf32>
    %43 = vector.broadcast %42 : vector<16x1xf32> to vector<16x8xf32>
    %44 = arith.mulf %43, %9 : vector<16x8xf32>
    %45 = arith.addf %41, %44 : vector<16x8xf32>
    %46 = vector.extract_strided_slice %0 {offsets = [0, 3], sizes = [16, 1], strides = [1, 1]} : vector<16x8xf32> to vector<16x1xf32>
    %47 = vector.broadcast %46 : vector<16x1xf32> to vector<16x8xf32>
    %48 = arith.mulf %47, %12 : vector<16x8xf32>
    %49 = arith.addf %45, %48 : vector<16x8xf32>
    %50 = vector.extract_strided_slice %0 {offsets = [0, 4], sizes = [16, 1], strides = [1, 1]} : vector<16x8xf32> to vector<16x1xf32>
    %51 = vector.broadcast %50 : vector<16x1xf32> to vector<16x8xf32>
    %52 = arith.mulf %51, %15 : vector<16x8xf32>
    %53 = arith.addf %49, %52 : vector<16x8xf32>
    %cst = arith.constant 0.000000e+00 : f32
    %54 = vector.broadcast %cst : f32 to vector<2x2xf32>
    %cst_12 = arith.constant 0.000000e+00 : f32
    %55 = vector.broadcast %cst_12 : f32 to vector<2x2xf32>
    %56 = vector.extract_strided_slice %53 {offsets = [0, 0], sizes = [2, 8], strides = [1, 1]} : vector<16x8xf32> to vector<2x8xf32>
    %57 = vector.extract_strided_slice %54 {offsets = [0, 0], sizes = [2, 1], strides = [1, 1]} : vector<2x2xf32> to vector<2x1xf32>
    %58 = vector.broadcast %57 : vector<2x1xf32> to vector<2x8xf32>
    %59 = arith.mulf %58, %21 : vector<2x8xf32>
    %60 = vector.extract_strided_slice %54 {offsets = [0, 1], sizes = [2, 1], strides = [1, 1]} : vector<2x2xf32> to vector<2x1xf32>
    %61 = vector.broadcast %60 : vector<2x1xf32> to vector<2x8xf32>
    %62 = arith.mulf %61, %24 : vector<2x8xf32>
    %63 = arith.addf %59, %62 : vector<2x8xf32>
    %64 = arith.addf %56, %63 : vector<2x8xf32>
    %65 = arith.negf %64 : vector<2x8xf32>
    %66 = math.exp %65 : vector<2x8xf32>
    %cst_13 = arith.constant 1.000000e+00 : f32
    %67 = vector.broadcast %cst_13 : f32 to vector<2x8xf32>
    %68 = arith.addf %67, %66 : vector<2x8xf32>
    %69 = arith.divf %67, %68 : vector<2x8xf32>
    %70 = vector.extract_strided_slice %69 {offsets = [0, 0], sizes = [2, 2], strides = [1, 1]} : vector<2x8xf32> to vector<2x2xf32>
    %71 = vector.extract_strided_slice %69 {offsets = [0, 2], sizes = [2, 2], strides = [1, 1]} : vector<2x8xf32> to vector<2x2xf32>
    %72 = vector.extract_strided_slice %69 {offsets = [0, 4], sizes = [2, 2], strides = [1, 1]} : vector<2x8xf32> to vector<2x2xf32>
    %cst_14 = arith.constant 2.000000e+00 : f32
    %73 = vector.broadcast %cst_14 : f32 to vector<2x2xf32>
    %74 = arith.mulf %73, %72 : vector<2x2xf32>
    %cst_15 = arith.constant 1.000000e+00 : f32
    %75 = vector.broadcast %cst_15 : f32 to vector<2x2xf32>
    %76 = arith.subf %74, %75 : vector<2x2xf32>
    %77 = vector.extract_strided_slice %69 {offsets = [0, 6], sizes = [2, 2], strides = [1, 1]} : vector<2x8xf32> to vector<2x2xf32>
    %78 = arith.mulf %71, %55 : vector<2x2xf32>
    %79 = arith.mulf %70, %76 : vector<2x2xf32>
    %80 = arith.addf %78, %79 : vector<2x2xf32>
    %81 = math.tanh %80 : vector<2x2xf32>
    %82 = arith.mulf %77, %81 : vector<2x2xf32>
    %83 = vector.extract_strided_slice %53 {offsets = [2, 0], sizes = [2, 8], strides = [1, 1]} : vector<16x8xf32> to vector<2x8xf32>
    %84 = vector.extract_strided_slice %82 {offsets = [0, 0], sizes = [2, 1], strides = [1, 1]} : vector<2x2xf32> to vector<2x1xf32>
    %85 = vector.broadcast %84 : vector<2x1xf32> to vector<2x8xf32>
    %86 = arith.mulf %85, %21 : vector<2x8xf32>
    %87 = vector.extract_strided_slice %82 {offsets = [0, 1], sizes = [2, 1], strides = [1, 1]} : vector<2x2xf32> to vector<2x1xf32>
    %88 = vector.broadcast %87 : vector<2x1xf32> to vector<2x8xf32>
    %89 = arith.mulf %88, %24 : vector<2x8xf32>
    %90 = arith.addf %86, %89 : vector<2x8xf32>
    %91 = arith.addf %83, %90 : vector<2x8xf32>
    %92 = arith.negf %91 : vector<2x8xf32>
    %93 = math.exp %92 : vector<2x8xf32>
    %cst_16 = arith.constant 1.000000e+00 : f32
    %94 = vector.broadcast %cst_16 : f32 to vector<2x8xf32>
    %95 = arith.addf %94, %93 : vector<2x8xf32>
    %96 = arith.divf %94, %95 : vector<2x8xf32>
    %97 = vector.extract_strided_slice %96 {offsets = [0, 0], sizes = [2, 2], strides = [1, 1]} : vector<2x8xf32> to vector<2x2xf32>
    %98 = vector.extract_strided_slice %96 {offsets = [0, 2], sizes = [2, 2], strides = [1, 1]} : vector<2x8xf32> to vector<2x2xf32>
    %99 = vector.extract_strided_slice %96 {offsets = [0, 4], sizes = [2, 2], strides = [1, 1]} : vector<2x8xf32> to vector<2x2xf32>
    %cst_17 = arith.constant 2.000000e+00 : f32
    %100 = vector.broadcast %cst_17 : f32 to vector<2x2xf32>
    %101 = arith.mulf %100, %99 : vector<2x2xf32>
    %cst_18 = arith.constant 1.000000e+00 : f32
    %102 = vector.broadcast %cst_18 : f32 to vector<2x2xf32>
    %103 = arith.subf %101, %102 : vector<2x2xf32>
    %104 = vector.extract_strided_slice %96 {offsets = [0, 6], sizes = [2, 2], strides = [1, 1]} : vector<2x8xf32> to vector<2x2xf32>
    %105 = arith.mulf %98, %80 : vector<2x2xf32>
    %106 = arith.mulf %97, %103 : vector<2x2xf32>
    %107 = arith.addf %105, %106 : vector<2x2xf32>
    %108 = math.tanh %107 : vector<2x2xf32>
    %109 = arith.mulf %104, %108 : vector<2x2xf32>
    %110 = vector.extract_strided_slice %53 {offsets = [4, 0], sizes = [2, 8], strides = [1, 1]} : vector<16x8xf32> to vector<2x8xf32>
    %111 = vector.extract_strided_slice %109 {offsets = [0, 0], sizes = [2, 1], strides = [1, 1]} : vector<2x2xf32> to vector<2x1xf32>
    %112 = vector.broadcast %111 : vector<2x1xf32> to vector<2x8xf32>
    %113 = arith.mulf %112, %21 : vector<2x8xf32>
    %114 = vector.extract_strided_slice %109 {offsets = [0, 1], sizes = [2, 1], strides = [1, 1]} : vector<2x2xf32> to vector<2x1xf32>
    %115 = vector.broadcast %114 : vector<2x1xf32> to vector<2x8xf32>
    %116 = arith.mulf %115, %24 : vector<2x8xf32>
    %117 = arith.addf %113, %116 : vector<2x8xf32>
    %118 = arith.addf %110, %117 : vector<2x8xf32>
    %119 = arith.negf %118 : vector<2x8xf32>
    %120 = math.exp %119 : vector<2x8xf32>
    %cst_19 = arith.constant 1.000000e+00 : f32
    %121 = vector.broadcast %cst_19 : f32 to vector<2x8xf32>
    %122 = arith.addf %121, %120 : vector<2x8xf32>
    %123 = arith.divf %121, %122 : vector<2x8xf32>
    %124 = vector.extract_strided_slice %123 {offsets = [0, 0], sizes = [2, 2], strides = [1, 1]} : vector<2x8xf32> to vector<2x2xf32>
    %125 = vector.extract_strided_slice %123 {offsets = [0, 2], sizes = [2, 2], strides = [1, 1]} : vector<2x8xf32> to vector<2x2xf32>
    %126 = vector.extract_strided_slice %123 {offsets = [0, 4], sizes = [2, 2], strides = [1, 1]} : vector<2x8xf32> to vector<2x2xf32>
    %cst_20 = arith.constant 2.000000e+00 : f32
    %127 = vector.broadcast %cst_20 : f32 to vector<2x2xf32>
    %128 = arith.mulf %127, %126 : vector<2x2xf32>
    %cst_21 = arith.constant 1.000000e+00 : f32
    %129 = vector.broadcast %cst_21 : f32 to vector<2x2xf32>
    %130 = arith.subf %128, %129 : vector<2x2xf32>
    %131 = vector.extract_strided_slice %123 {offsets = [0, 6], sizes = [2, 2], strides = [1, 1]} : vector<2x8xf32> to vector<2x2xf32>
    %132 = arith.mulf %125, %107 : vector<2x2xf32>
    %133 = arith.mulf %124, %130 : vector<2x2xf32>
    %134 = arith.addf %132, %133 : vector<2x2xf32>
    %135 = math.tanh %134 : vector<2x2xf32>
    %136 = arith.mulf %131, %135 : vector<2x2xf32>
    %137 = vector.extract_strided_slice %53 {offsets = [6, 0], sizes = [2, 8], strides = [1, 1]} : vector<16x8xf32> to vector<2x8xf32>
    %138 = vector.extract_strided_slice %136 {offsets = [0, 0], sizes = [2, 1], strides = [1, 1]} : vector<2x2xf32> to vector<2x1xf32>
    %139 = vector.broadcast %138 : vector<2x1xf32> to vector<2x8xf32>
    %140 = arith.mulf %139, %21 : vector<2x8xf32>
    %141 = vector.extract_strided_slice %136 {offsets = [0, 1], sizes = [2, 1], strides = [1, 1]} : vector<2x2xf32> to vector<2x1xf32>
    %142 = vector.broadcast %141 : vector<2x1xf32> to vector<2x8xf32>
    %143 = arith.mulf %142, %24 : vector<2x8xf32>
    %144 = arith.addf %140, %143 : vector<2x8xf32>
    %145 = arith.addf %137, %144 : vector<2x8xf32>
    %146 = arith.negf %145 : vector<2x8xf32>
    %147 = math.exp %146 : vector<2x8xf32>
    %cst_22 = arith.constant 1.000000e+00 : f32
    %148 = vector.broadcast %cst_22 : f32 to vector<2x8xf32>
    %149 = arith.addf %148, %147 : vector<2x8xf32>
    %150 = arith.divf %148, %149 : vector<2x8xf32>
    %151 = vector.extract_strided_slice %150 {offsets = [0, 0], sizes = [2, 2], strides = [1, 1]} : vector<2x8xf32> to vector<2x2xf32>
    %152 = vector.extract_strided_slice %150 {offsets = [0, 2], sizes = [2, 2], strides = [1, 1]} : vector<2x8xf32> to vector<2x2xf32>
    %153 = vector.extract_strided_slice %150 {offsets = [0, 4], sizes = [2, 2], strides = [1, 1]} : vector<2x8xf32> to vector<2x2xf32>
    %cst_23 = arith.constant 2.000000e+00 : f32
    %154 = vector.broadcast %cst_23 : f32 to vector<2x2xf32>
    %155 = arith.mulf %154, %153 : vector<2x2xf32>
    %cst_24 = arith.constant 1.000000e+00 : f32
    %156 = vector.broadcast %cst_24 : f32 to vector<2x2xf32>
    %157 = arith.subf %155, %156 : vector<2x2xf32>
    %158 = vector.extract_strided_slice %150 {offsets = [0, 6], sizes = [2, 2], strides = [1, 1]} : vector<2x8xf32> to vector<2x2xf32>
    %159 = arith.mulf %152, %134 : vector<2x2xf32>
    %160 = arith.mulf %151, %157 : vector<2x2xf32>
    %161 = arith.addf %159, %160 : vector<2x2xf32>
    %162 = math.tanh %161 : vector<2x2xf32>
    %163 = arith.mulf %158, %162 : vector<2x2xf32>
    %164 = vector.extract_strided_slice %53 {offsets = [8, 0], sizes = [2, 8], strides = [1, 1]} : vector<16x8xf32> to vector<2x8xf32>
    %165 = vector.extract_strided_slice %163 {offsets = [0, 0], sizes = [2, 1], strides = [1, 1]} : vector<2x2xf32> to vector<2x1xf32>
    %166 = vector.broadcast %165 : vector<2x1xf32> to vector<2x8xf32>
    %167 = arith.mulf %166, %21 : vector<2x8xf32>
    %168 = vector.extract_strided_slice %163 {offsets = [0, 1], sizes = [2, 1], strides = [1, 1]} : vector<2x2xf32> to vector<2x1xf32>
    %169 = vector.broadcast %168 : vector<2x1xf32> to vector<2x8xf32>
    %170 = arith.mulf %169, %24 : vector<2x8xf32>
    %171 = arith.addf %167, %170 : vector<2x8xf32>
    %172 = arith.addf %164, %171 : vector<2x8xf32>
    %173 = arith.negf %172 : vector<2x8xf32>
    %174 = math.exp %173 : vector<2x8xf32>
    %cst_25 = arith.constant 1.000000e+00 : f32
    %175 = vector.broadcast %cst_25 : f32 to vector<2x8xf32>
    %176 = arith.addf %175, %174 : vector<2x8xf32>
    %177 = arith.divf %175, %176 : vector<2x8xf32>
    %178 = vector.extract_strided_slice %177 {offsets = [0, 0], sizes = [2, 2], strides = [1, 1]} : vector<2x8xf32> to vector<2x2xf32>
    %179 = vector.extract_strided_slice %177 {offsets = [0, 2], sizes = [2, 2], strides = [1, 1]} : vector<2x8xf32> to vector<2x2xf32>
    %180 = vector.extract_strided_slice %177 {offsets = [0, 4], sizes = [2, 2], strides = [1, 1]} : vector<2x8xf32> to vector<2x2xf32>
    %cst_26 = arith.constant 2.000000e+00 : f32
    %181 = vector.broadcast %cst_26 : f32 to vector<2x2xf32>
    %182 = arith.mulf %181, %180 : vector<2x2xf32>
    %cst_27 = arith.constant 1.000000e+00 : f32
    %183 = vector.broadcast %cst_27 : f32 to vector<2x2xf32>
    %184 = arith.subf %182, %183 : vector<2x2xf32>
    %185 = vector.extract_strided_slice %177 {offsets = [0, 6], sizes = [2, 2], strides = [1, 1]} : vector<2x8xf32> to vector<2x2xf32>
    %186 = arith.mulf %179, %161 : vector<2x2xf32>
    %187 = arith.mulf %178, %184 : vector<2x2xf32>
    %188 = arith.addf %186, %187 : vector<2x2xf32>
    %189 = math.tanh %188 : vector<2x2xf32>
    %190 = arith.mulf %185, %189 : vector<2x2xf32>
    %191 = vector.extract_strided_slice %53 {offsets = [10, 0], sizes = [2, 8], strides = [1, 1]} : vector<16x8xf32> to vector<2x8xf32>
    %192 = vector.extract_strided_slice %190 {offsets = [0, 0], sizes = [2, 1], strides = [1, 1]} : vector<2x2xf32> to vector<2x1xf32>
    %193 = vector.broadcast %192 : vector<2x1xf32> to vector<2x8xf32>
    %194 = arith.mulf %193, %21 : vector<2x8xf32>
    %195 = vector.extract_strided_slice %190 {offsets = [0, 1], sizes = [2, 1], strides = [1, 1]} : vector<2x2xf32> to vector<2x1xf32>
    %196 = vector.broadcast %195 : vector<2x1xf32> to vector<2x8xf32>
    %197 = arith.mulf %196, %24 : vector<2x8xf32>
    %198 = arith.addf %194, %197 : vector<2x8xf32>
    %199 = arith.addf %191, %198 : vector<2x8xf32>
    %200 = arith.negf %199 : vector<2x8xf32>
    %201 = math.exp %200 : vector<2x8xf32>
    %cst_28 = arith.constant 1.000000e+00 : f32
    %202 = vector.broadcast %cst_28 : f32 to vector<2x8xf32>
    %203 = arith.addf %202, %201 : vector<2x8xf32>
    %204 = arith.divf %202, %203 : vector<2x8xf32>
    %205 = vector.extract_strided_slice %204 {offsets = [0, 0], sizes = [2, 2], strides = [1, 1]} : vector<2x8xf32> to vector<2x2xf32>
    %206 = vector.extract_strided_slice %204 {offsets = [0, 2], sizes = [2, 2], strides = [1, 1]} : vector<2x8xf32> to vector<2x2xf32>
    %207 = vector.extract_strided_slice %204 {offsets = [0, 4], sizes = [2, 2], strides = [1, 1]} : vector<2x8xf32> to vector<2x2xf32>
    %cst_29 = arith.constant 2.000000e+00 : f32
    %208 = vector.broadcast %cst_29 : f32 to vector<2x2xf32>
    %209 = arith.mulf %208, %207 : vector<2x2xf32>
    %cst_30 = arith.constant 1.000000e+00 : f32
    %210 = vector.broadcast %cst_30 : f32 to vector<2x2xf32>
    %211 = arith.subf %209, %210 : vector<2x2xf32>
    %212 = vector.extract_strided_slice %204 {offsets = [0, 6], sizes = [2, 2], strides = [1, 1]} : vector<2x8xf32> to vector<2x2xf32>
    %213 = arith.mulf %206, %188 : vector<2x2xf32>
    %214 = arith.mulf %205, %211 : vector<2x2xf32>
    %215 = arith.addf %213, %214 : vector<2x2xf32>
    %216 = math.tanh %215 : vector<2x2xf32>
    %217 = arith.mulf %212, %216 : vector<2x2xf32>
    %218 = vector.extract_strided_slice %53 {offsets = [12, 0], sizes = [2, 8], strides = [1, 1]} : vector<16x8xf32> to vector<2x8xf32>
    %219 = vector.extract_strided_slice %217 {offsets = [0, 0], sizes = [2, 1], strides = [1, 1]} : vector<2x2xf32> to vector<2x1xf32>
    %220 = vector.broadcast %219 : vector<2x1xf32> to vector<2x8xf32>
    %221 = arith.mulf %220, %21 : vector<2x8xf32>
    %222 = vector.extract_strided_slice %217 {offsets = [0, 1], sizes = [2, 1], strides = [1, 1]} : vector<2x2xf32> to vector<2x1xf32>
    %223 = vector.broadcast %222 : vector<2x1xf32> to vector<2x8xf32>
    %224 = arith.mulf %223, %24 : vector<2x8xf32>
    %225 = arith.addf %221, %224 : vector<2x8xf32>
    %226 = arith.addf %218, %225 : vector<2x8xf32>
    %227 = arith.negf %226 : vector<2x8xf32>
    %228 = math.exp %227 : vector<2x8xf32>
    %cst_31 = arith.constant 1.000000e+00 : f32
    %229 = vector.broadcast %cst_31 : f32 to vector<2x8xf32>
    %230 = arith.addf %229, %228 : vector<2x8xf32>
    %231 = arith.divf %229, %230 : vector<2x8xf32>
    %232 = vector.extract_strided_slice %231 {offsets = [0, 0], sizes = [2, 2], strides = [1, 1]} : vector<2x8xf32> to vector<2x2xf32>
    %233 = vector.extract_strided_slice %231 {offsets = [0, 2], sizes = [2, 2], strides = [1, 1]} : vector<2x8xf32> to vector<2x2xf32>
    %234 = vector.extract_strided_slice %231 {offsets = [0, 4], sizes = [2, 2], strides = [1, 1]} : vector<2x8xf32> to vector<2x2xf32>
    %cst_32 = arith.constant 2.000000e+00 : f32
    %235 = vector.broadcast %cst_32 : f32 to vector<2x2xf32>
    %236 = arith.mulf %235, %234 : vector<2x2xf32>
    %cst_33 = arith.constant 1.000000e+00 : f32
    %237 = vector.broadcast %cst_33 : f32 to vector<2x2xf32>
    %238 = arith.subf %236, %237 : vector<2x2xf32>
    %239 = vector.extract_strided_slice %231 {offsets = [0, 6], sizes = [2, 2], strides = [1, 1]} : vector<2x8xf32> to vector<2x2xf32>
    %240 = arith.mulf %233, %215 : vector<2x2xf32>
    %241 = arith.mulf %232, %238 : vector<2x2xf32>
    %242 = arith.addf %240, %241 : vector<2x2xf32>
    %243 = math.tanh %242 : vector<2x2xf32>
    %244 = arith.mulf %239, %243 : vector<2x2xf32>
    %245 = vector.extract_strided_slice %53 {offsets = [14, 0], sizes = [2, 8], strides = [1, 1]} : vector<16x8xf32> to vector<2x8xf32>
    %246 = vector.extract_strided_slice %244 {offsets = [0, 0], sizes = [2, 1], strides = [1, 1]} : vector<2x2xf32> to vector<2x1xf32>
    %247 = vector.broadcast %246 : vector<2x1xf32> to vector<2x8xf32>
    %248 = arith.mulf %247, %21 : vector<2x8xf32>
    %249 = vector.extract_strided_slice %244 {offsets = [0, 1], sizes = [2, 1], strides = [1, 1]} : vector<2x2xf32> to vector<2x1xf32>
    %250 = vector.broadcast %249 : vector<2x1xf32> to vector<2x8xf32>
    %251 = arith.mulf %250, %24 : vector<2x8xf32>
    %252 = arith.addf %248, %251 : vector<2x8xf32>
    %253 = arith.addf %245, %252 : vector<2x8xf32>
    %254 = arith.negf %253 : vector<2x8xf32>
    %255 = math.exp %254 : vector<2x8xf32>
    %cst_34 = arith.constant 1.000000e+00 : f32
    %256 = vector.broadcast %cst_34 : f32 to vector<2x8xf32>
    %257 = arith.addf %256, %255 : vector<2x8xf32>
    %258 = arith.divf %256, %257 : vector<2x8xf32>
    %259 = vector.extract_strided_slice %258 {offsets = [0, 0], sizes = [2, 2], strides = [1, 1]} : vector<2x8xf32> to vector<2x2xf32>
    %260 = vector.extract_strided_slice %258 {offsets = [0, 2], sizes = [2, 2], strides = [1, 1]} : vector<2x8xf32> to vector<2x2xf32>
    %261 = vector.extract_strided_slice %258 {offsets = [0, 4], sizes = [2, 2], strides = [1, 1]} : vector<2x8xf32> to vector<2x2xf32>
    %cst_35 = arith.constant 2.000000e+00 : f32
    %262 = vector.broadcast %cst_35 : f32 to vector<2x2xf32>
    %263 = arith.mulf %262, %261 : vector<2x2xf32>
    %cst_36 = arith.constant 1.000000e+00 : f32
    %264 = vector.broadcast %cst_36 : f32 to vector<2x2xf32>
    %265 = arith.subf %263, %264 : vector<2x2xf32>
    %266 = vector.extract_strided_slice %258 {offsets = [0, 6], sizes = [2, 2], strides = [1, 1]} : vector<2x8xf32> to vector<2x2xf32>
    %267 = arith.mulf %260, %242 : vector<2x2xf32>
    %268 = arith.mulf %259, %265 : vector<2x2xf32>
    %269 = arith.addf %267, %268 : vector<2x2xf32>
    %270 = math.tanh %269 : vector<2x2xf32>
    %271 = arith.mulf %266, %270 : vector<2x2xf32>
    %272 = vector.extract_strided_slice %271 {offsets = [0, 0], sizes = [2, 1], strides = [1, 1]} : vector<2x2xf32> to vector<2x1xf32>
    %273 = vector.broadcast %272 : vector<2x1xf32> to vector<2x3xf32>
    %274 = arith.mulf %273, %27 : vector<2x3xf32>
    %275 = arith.addf %33, %274 : vector<2x3xf32>
    %276 = vector.extract_strided_slice %271 {offsets = [0, 1], sizes = [2, 1], strides = [1, 1]} : vector<2x2xf32> to vector<2x1xf32>
    %277 = vector.broadcast %276 : vector<2x1xf32> to vector<2x3xf32>
    %278 = arith.mulf %277, %30 : vector<2x3xf32>
    %279 = arith.addf %275, %278 : vector<2x3xf32>
    %cst_37 = arith.constant dense<0xFF800000> : vector<2xf32>
    %280 = vector.multi_reduction <maximumf>, %279, %cst_37 [1] : vector<2x3xf32> to vector<2xf32>
    %281 = vector.shape_cast %280 : vector<2xf32> to vector<2x1xf32>
    %282 = vector.broadcast %281 : vector<2x1xf32> to vector<2x3xf32>
    %283 = arith.subf %279, %282 : vector<2x3xf32>
    %284 = math.exp %283 : vector<2x3xf32>
    %cst_38 = arith.constant dense<0.000000e+00> : vector<2xf32>
    %285 = vector.multi_reduction <add>, %284, %cst_38 [1] : vector<2x3xf32> to vector<2xf32>
    %286 = vector.shape_cast %285 : vector<2xf32> to vector<2x1xf32>
    %287 = vector.broadcast %286 : vector<2x1xf32> to vector<2x3xf32>
    %288 = arith.divf %284, %287 : vector<2x3xf32>
    %c0_39 = arith.constant 0 : index
    %c0_40 = arith.constant 0 : index
    %289 = vector.load %arg1[%c0_39, %c0_40] : memref<2x3xf32, #tpu.memory_space<vmem>>, vector<2x3xf32>
    tpu.vector_store %arg1[%c0_39, %c0_40], %288 {strides = array<i32>} : memref<2x3xf32, #tpu.memory_space<vmem>>, vector<2x3xf32>,
    return
  }
}

</mosaic_0001>

<bundles_post_ra>
// kernel: lstm_class_forward.1
= control target key start
LH: loop header
LB: loop body
LE: loop exit
PB: predicated region body
PF: predicated region fallthrough
CT: control target
= control target key end

     0   :  { %v640_v1 = vmov 0   ;;  %v641_v2 = vmov 2   ;;  %s816_s0 = inlined_call_operand.vmem [shape: f32[27,8], index: 0, kind: input, shape index: {}]   ;;  %s817_s1 = inlined_call_operand.hbm [shape: f32[2,3], index: 1, kind: output, shape index: {}]  }
   0x1   :  { %v9_v0 = vld [vmem:[%s816_s0] sm:$0xff]  ;;  %543 = vset.pattern.permute.xlu0 %v640_v1  ;;  %545 = vset.pattern.permute.xlu1 %v641_v2 }
   0x2   :  { %68 = vperm.xlu0 %543, %v9_v0   ;;  %93 = vperm.xlu1 %545, %v9_v0  }
   0x3   :  { %6 = vsyncpa [#allocation3], 0  ;;  %v642_v3 = vmov 1   ;;  %v643_v4 = vmov 3   ;;  %v644_v5 = vmov 4   ;;  %s645_s24 = smov 124  }
   0x4   :  { %v672_v6 = vld [vmem:[%s816_s0 + $0x10] ss:$0 sm:$0xff]  ;;  %v678_v10 = vld [vmem:[%s816_s0 + $0x17] ss:$0 sm:$0xff]  ;;  %v683_v11 = vld [vmem:[%s816_s0 + $0x11] ss:$0 sm:$0xff] }
   0x5   :  { %v688_v12 = vld [vmem:[%s816_s0 + $0x12] ss:$0 sm:$0xff]  ;;  %v693_v15 = vld [vmem:[%s816_s0 + $0x15] ss:$0 sm:$0xff]  ;;  %v698_v16 = vld [vmem:[%s816_s0 + $0x16] ss:$0 sm:$0xff] }
   0x6   :  { %544 = vset.pattern.permute.xlu0 %v642_v3  ;;  %546 = vset.pattern.permute.xlu1 %v643_v4  ;;  %v705_v19 = vld [vmem:[%s816_s0 + $0x13] ss:$0 sm:$0xff]  ;;  %v711_v22 = vld [vmem:[%s816_s0 + $0x14] ss:$0 sm:$0xff]  ;;  %v128_v23 = vmul.f32 0.0, %v693_v15  ;;  %v129_v24 = vmul.f32 0.0, %v698_v16 }
   0x7   :  { %81 = vperm.xlu0 %544, %v9_v0   ;;  %105 = vperm.xlu1 %546, %v9_v0   ;;  %s646_s25 = smov 2   ;;  %v647_v44 = vmov 6   ;;  %v648_v45 = vmov 7   ;;  %s649_s26 = smov 4   ;;  %vm478_vm0 = vcmask 23558  }
   0x8   :  { %v130_v30 = vadd.f32 %v129_v24, %v128_v23 }
   0xb   :  { %547 = vset.pattern.permute.xlu1 %v644_v5  ;;  %549 = vset.pattern.permute.xlu0 %v648_v45 }
   0xc   :  { %117 = vperm.xlu1 %547, %v9_v0  }
  0x10   :  { %548 = vset.pattern.permute.xlu1 %v647_v44 }
  0x81   :  { %v69_v7 = vpop.permute.xlu0 %68  ;;  %v94_v8 = vpop.permute.xlu1 %93 }
  0x82   :  { %v76_v9 = vmul.f32 %v672_v6, %v69_v7  ;;  %v100_v20 = vmul.f32 %v688_v12, %v94_v8 }
  0x84   :  { %v78_v17 = vadd.f32 %v678_v10, %v76_v9 }
  0x86   :  { %v82_v13 = vpop.permute.xlu0 %81  ;;  %v106_v14 = vpop.permute.xlu1 %105 }
  0x87   :  { %v88_v18 = vmul.f32 %v683_v11, %v82_v13  ;;  %v112_v26 = vmul.f32 %v705_v19, %v106_v14 }
  0x89   :  { %v90_v21 = vadd.f32 %v88_v18, %v78_v17 }
  0x8b   :  { %v102_v25 = vadd.f32 %v100_v20, %v90_v21  ;;  %v118_v27 = vpop.permute.xlu1 %117 }
  0x8c   :  { %v124_v28 = vmul.f32 %v711_v22, %v118_v27 }
  0x8d   :  { %v114_v29 = vadd.f32 %v112_v26, %v102_v25 }
  0x8f   :  { %v717_v31 = vadd.f32 %v124_v28, %v114_v29 }
  0x91   :  { %v131_v32 = vadd.f32 %v130_v30, %v717_v31 }
  0x93   :  { %v516_v33 = vmul.f32 -1.442695, %v131_v32 }
  0x95   :  { %564 = vpow2.f32 %v516_v33 }
  0x9f   :  { %v565_v34 = vpop.eup %564 }
  0xa0   :  { %v135_v35 = vadd.f32 1.0, %v565_v34 }
  0xa2   :  { %566 = vrcp.f32 %v135_v35 }
  0xac   :  { %v567_v36 = vpop.eup %566 }
  0xad   :  { %v138_v37 = vmul.f32 2.0, %v567_v36  ;;  %v140_v41 = vmul.f32 0.0, %v567_v36 }
  0xaf   :  { %v517_v38 = vadd.f32 -1.0, %v138_v37 }
  0xb1   :  { %142 = vrot.lane.b32.xlu0 %v517_v38, %s645_s24 }
 0x123   :  { %v143_v39 = vpop.permute.xlu0 %142 }
 0x124   :  { %v145_v40 = vmul.f32 %v567_v36, %v143_v39 }
 0x126   :  { %147 = vrot.lane.b32.xlu1 %v145_v40, %s646_s25 }
 0x198   :  { %v148_v42 = vpop.permute.xlu1 %147 }
 0x199   :  { %v150_v43 = vadd.f32 %v148_v42, %v140_v41 }
 0x19b   :  { %568 = vtanh.f32 %v150_v43  ;;  %v182_v0 = vrot.slane %v150_v43, 6 }
 0x1a5   :  { %v569_v46 = vpop.eup %568 }
 0x1a6   :  { %153 = vrot.lane.b32.xlu0 %v569_v46, %s649_s26 }
 0x218   :  { %v154_v47 = vpop.permute.xlu0 %153 }
 0x219   :  { %v156_v48 = vmul.f32 %v567_v36, %v154_v47 }
 0x21b   :  { %164 = vperm.xlu0 %549, %v156_v48   ;;  %159 = vperm.xlu1 %548, %v156_v48  }
 0x29a   :  { %v165_v49 = vpop.permute.xlu0 %164  ;;  %v160_v50 = vpop.permute.xlu1 %159 }
 0x29b   :  { %v167_v51 = vmul.f32 %v698_v16, %v165_v49  ;;  %v162_v52 = vmul.f32 %v693_v15, %v160_v50 }
 0x29d   :  { %v168_v53 = vadd.f32 %v167_v51, %v162_v52 }
 0x29f   :  { %v170_v54 = vrot.slane %v168_v53, 6 }
 0x2a1   :  { %v172_v55 = vadd.f32 %v170_v54, %v717_v31 }
 0x2a3   :  { %v518_v56 = vmul.f32 -1.442695, %v172_v55 }
 0x2a5   :  { %570 = vpow2.f32 %v518_v56 }
 0x2af   :  { %v571_v57 = vpop.eup %570 }
 0x2b0   :  { %v176_v58 = vadd.f32 1.0, %v571_v57 }
 0x2b2   :  { %572 = vrcp.f32 %v176_v58  ;;  %v10_v58 = vld [vmem:[%s816_s0 + $0x8] sm:$0xff] }
 0x2bc   :  { %v573_v59 = vpop.eup %572 }
 0x2bd   :  { %v179_v60 = vmul.f32 2.0, %v573_v59  ;;  %v184_v7 = vmul.f32 %v573_v59, %v182_v0 }
 0x2bf   :  { %v519_v61 = vadd.f32 -1.0, %v179_v60 }
 0x2c1   :  { %186 = vrot.lane.b32.xlu1 %v519_v61, %s645_s24 }
 0x333   :  { %v187_v62 = vpop.permute.xlu1 %186 }
 0x334   :  { %v189_v63 = vmul.f32 %v573_v59, %v187_v62 }
 0x336   :  { %191 = vrot.lane.b32.xlu1 %v189_v63, %s646_s25 }
 0x3a8   :  { %v192_v8 = vpop.permute.xlu1 %191 }
 0x3a9   :  { %v194_v9 = vadd.f32 %v192_v8, %v184_v7 }
 0x3ab   :  { %574 = vtanh.f32 %v194_v9  ;;  %v226_v36 = vrot.slane %v194_v9, 6 }
 0x3b5   :  { %v575_v13 = vpop.eup %574 }
 0x3b6   :  { %197 = vrot.lane.b32.xlu0 %v575_v13, %s649_s26 }
 0x428   :  { %v198_v14 = vpop.permute.xlu0 %197 }
 0x429   :  { %v200_v17 = vmul.f32 %v573_v59, %v198_v14 }
 0x42b   :  { %208 = vperm.xlu0 %549, %v200_v17   ;;  %203 = vperm.xlu1 %548, %v200_v17  }
 0x42f   :  { %550 = vset.pattern.permute.xlu0 %v647_v44  ;;  %551 = vset.pattern.permute.xlu1 %v648_v45 }
 0x4aa   :  { %v209_v18 = vpop.permute.xlu0 %208  ;;  %v204_v20 = vpop.permute.xlu1 %203 }
 0x4ab   :  { %v211_v21 = vmul.f32 %v698_v16, %v209_v18  ;;  %v206_v23 = vmul.f32 %v693_v15, %v204_v20 }
 0x4ad   :  { %v212_v24 = vadd.f32 %v211_v21, %v206_v23 }
 0x4af   :  { %v214_v25 = vrot.slane %v212_v24, 6 }
 0x4b1   :  { %v216_v26 = vadd.f32 %v214_v25, %v717_v31 }
 0x4b3   :  { %v520_v27 = vmul.f32 -1.442695, %v216_v26 }
 0x4b5   :  { %576 = vpow2.f32 %v520_v27 }
 0x4bf   :  { %v577_v28 = vpop.eup %576 }
 0x4c0   :  { %v220_v29 = vadd.f32 1.0, %v577_v28 }
 0x4c2   :  { %578 = vrcp.f32 %v220_v29 }
 0x4cc   :  { %v579_v30 = vpop.eup %578 }
 0x4cd   :  { %v223_v32 = vmul.f32 2.0, %v579_v30  ;;  %v228_v37 = vmul.f32 %v579_v30, %v226_v36 }
 0x4cf   :  { %v521_v33 = vadd.f32 -1.0, %v223_v32 }
 0x4d1   :  { %230 = vrot.lane.b32.xlu1 %v521_v33, %s645_s24 }
 0x543   :  { %v231_v34 = vpop.permute.xlu1 %230 }
 0x544   :  { %v233_v35 = vmul.f32 %v579_v30, %v231_v34 }
 0x546   :  { %235 = vrot.lane.b32.xlu0 %v233_v35, %s646_s25 }
 0x5b8   :  { %v236_v38 = vpop.permute.xlu0 %235 }
 0x5b9   :  { %v238_v39 = vadd.f32 %v236_v38, %v228_v37 }
 0x5bb   :  { %580 = vtanh.f32 %v238_v39 }
 0x5c5   :  { %v581_v40 = vpop.eup %580 }
 0x5c6   :  { %241 = vrot.lane.b32.xlu1 %v581_v40, %s649_s26 }
 0x638   :  { %v242_v41 = vpop.permute.xlu1 %241 }
 0x639   :  { %v244_v42 = vmul.f32 %v579_v30, %v242_v41 }
 0x63b   :  { %252 = vperm.xlu1 %551, %v244_v42   ;;  %247 = vperm.xlu0 %550, %v244_v42  }
 0x63f   :  { %552 = vset.pattern.permute.xlu0 %v640_v1  ;;  %553 = vset.pattern.permute.xlu1 %v642_v3 }
 0x6ba   :  { %v253_v43 = vpop.permute.xlu1 %252  ;;  %v248_v46 = vpop.permute.xlu0 %247 }
 0x6bb   :  { %v255_v47 = vmul.f32 %v698_v16, %v253_v43  ;;  %v250_v48 = vmul.f32 %v693_v15, %v248_v46 }
 0x6bd   :  { %v256_v49 = vadd.f32 %v255_v47, %v250_v48 }
 0x6bf   :  { %v258_v50 = vrot.slane %v256_v49, 6 }
 0x6c1   :  { %v260_v51 = vadd.f32 %v258_v50, %v717_v31  ;;  %v270_v31 = vrot.slane %v238_v39, 6 }
 0x6c3   :  { %v522_v52 = vmul.f32 -1.442695, %v260_v51 }
 0x6c5   :  { %582 = vpow2.f32 %v522_v52 }
 0x6cf   :  { %v583_v53 = vpop.eup %582 }
 0x6d0   :  { %v264_v54 = vadd.f32 1.0, %v583_v53 }
 0x6d2   :  { %584 = vrcp.f32 %v264_v54 }
 0x6dc   :  { %v585_v55 = vpop.eup %584 }
 0x6dd   :  { %v267_v56 = vmul.f32 2.0, %v585_v55  ;;  %v272_v59 = vmul.f32 %v585_v55, %v270_v31 }
 0x6df   :  { %v523_v1 = vadd.f32 -1.0, %v267_v56 }
 0x6e1   :  { %274 = vrot.lane.b32.xlu1 %v523_v1, %s645_s24 }
 0x753   :  { %v275_v3 = vpop.permute.xlu1 %274 }
 0x754   :  { %v277_v57 = vmul.f32 %v585_v55, %v275_v3 }
 0x756   :  { %279 = vrot.lane.b32.xlu0 %v277_v57, %s646_s25 }
 0x75a   :  { %73 = vperm.xlu0 %552, %v10_v58  }
 0x75e   :  { %555 = vset.pattern.permute.xlu0 %v643_v4 }
 0x75f   :  { %109 = vperm.xlu0 %555, %v10_v58  }
 0x763   :  { %558 = vset.pattern.permute.xlu0 %v644_v5 }
 0x764   :  { %121 = vperm.xlu0 %558, %v10_v58  }
 0x768   :  { %560 = vset.pattern.permute.xlu0 %v648_v45 }
 0x7c8   :  { %v280_v60 = vpop.permute.xlu0 %279 }
 0x7c9   :  { %v282_v61 = vadd.f32 %v280_v60, %v272_v59 }
 0x7cb   :  { %586 = vtanh.f32 %v282_v61  ;;  %v314_v36 = vrot.slane %v282_v61, 6 }
 0x7d5   :  { %v587_v62 = vpop.eup %586 }
 0x7d6   :  { %285 = vrot.lane.b32.xlu1 %v587_v62, %s649_s26 }
 0x7d9   :  { %v74_v5 = vpop.permute.xlu0 %73 }
 0x7da   :  { %85 = vperm.xlu1 %553, %v10_v58   ;;  %v77_v7 = vmul.f32 %v672_v6, %v74_v5 }
 0x7dc   :  { %v79_v9 = vadd.f32 %v678_v10, %v77_v7 }
 0x7de   :  { %554 = vset.pattern.permute.xlu1 %v641_v2  ;;  %v110_v13 = vpop.permute.xlu0 %109 }
 0x7df   :  { %97 = vperm.xlu1 %554, %v10_v58   ;;  %v113_v21 = vmul.f32 %v705_v19, %v110_v13 }
 0x7e3   :  { %556 = vset.pattern.permute.xlu1 %v647_v44  ;;  %v122_v23 = vpop.permute.xlu0 %121 }
 0x7e4   :  { %v125_v26 = vmul.f32 %v711_v22, %v122_v23 }
 0x848   :  { %v286_v4 = vpop.permute.xlu1 %285 }
 0x849   :  { %v288_v63 = vmul.f32 %v585_v55, %v286_v4 }
 0x84b   :  { %291 = vperm.xlu1 %556, %v288_v63  }
 0x84f   :  { %557 = vset.pattern.permute.xlu1 %v648_v45 }
 0x850   :  { %296 = vperm.xlu1 %557, %v288_v63  }
 0x854   :  { %559 = vset.pattern.permute.xlu1 %v647_v44 }
 0x859   :  { %v86_v0 = vpop.permute.xlu1 %85 }
 0x85a   :  { %v89_v8 = vmul.f32 %v683_v11, %v86_v0 }
 0x85c   :  { %v91_v14 = vadd.f32 %v89_v8, %v79_v9 }
 0x85e   :  { %v98_v2 = vpop.permute.xlu1 %97 }
 0x85f   :  { %v101_v17 = vmul.f32 %v688_v12, %v98_v2 }
 0x861   :  { %v103_v20 = vadd.f32 %v101_v17, %v91_v14 }
 0x863   :  { %v115_v25 = vadd.f32 %v113_v21, %v103_v20 }
 0x865   :  { %v765_v10 = vadd.f32 %v125_v26, %v115_v25 }
 0x8ca   :  { %v292_v18 = vpop.permute.xlu1 %291 }
 0x8cb   :  { %v294_v6 = vmul.f32 %v693_v15, %v292_v18 }
 0x8cf   :  { %v297_v24 = vpop.permute.xlu1 %296 }
 0x8d0   :  { %v299_v11 = vmul.f32 %v698_v16, %v297_v24 }
 0x8d2   :  { %v300_v27 = vadd.f32 %v299_v11, %v294_v6 }
 0x8d4   :  { %v302_v28 = vrot.slane %v300_v27, 6 }
 0x8d6   :  { %v304_v29 = vadd.f32 %v302_v28, %v765_v10 }
 0x8d8   :  { %v524_v12 = vmul.f32 -1.442695, %v304_v29 }
 0x8da   :  { %588 = vpow2.f32 %v524_v12 }
 0x8e4   :  { %v589_v30 = vpop.eup %588 }
 0x8e5   :  { %v308_v32 = vadd.f32 1.0, %v589_v30 }
 0x8e7   :  { %590 = vrcp.f32 %v308_v32 }
 0x8f1   :  { %v591_v19 = vpop.eup %590 }
 0x8f2   :  { %v311_v33 = vmul.f32 2.0, %v591_v19  ;;  %v316_v37 = vmul.f32 %v591_v19, %v314_v36 }
 0x8f4   :  { %v525_v34 = vadd.f32 -1.0, %v311_v33 }
 0x8f6   :  { %318 = vrot.lane.b32.xlu1 %v525_v34, %s645_s24 }
 0x968   :  { %v319_v22 = vpop.permute.xlu1 %318 }
 0x969   :  { %v321_v35 = vmul.f32 %v591_v19, %v319_v22 }
 0x96b   :  { %323 = vrot.lane.b32.xlu1 %v321_v35, %s646_s25 }
 0x9dd   :  { %v324_v38 = vpop.permute.xlu1 %323 }
 0x9de   :  { %v326_v39 = vadd.f32 %v324_v38, %v316_v37 }
 0x9e0   :  { %592 = vtanh.f32 %v326_v39  ;;  %v358_v58 = vrot.slane %v326_v39, 6 }
 0x9ea   :  { %v593_v40 = vpop.eup %592 }
 0x9eb   :  { %329 = vrot.lane.b32.xlu0 %v593_v40, %s649_s26 }
 0xa5d   :  { %v330_v41 = vpop.permute.xlu0 %329 }
 0xa5e   :  { %v332_v42 = vmul.f32 %v591_v19, %v330_v41 }
 0xa60   :  { %340 = vperm.xlu0 %560, %v332_v42   ;;  %335 = vperm.xlu1 %559, %v332_v42  }
 0xadf   :  { %v341_v43 = vpop.permute.xlu0 %340  ;;  %v336_v46 = vpop.permute.xlu1 %335 }
 0xae0   :  { %v343_v47 = vmul.f32 %v698_v16, %v341_v43  ;;  %v338_v48 = vmul.f32 %v693_v15, %v336_v46 }
 0xae2   :  { %v344_v49 = vadd.f32 %v343_v47, %v338_v48  ;;  %v513_v48 = vld [vmem:[%s816_s0 + $0x18] ss:$0 sm:$0xff] }
 0xae4   :  { %v346_v50 = vrot.slane %v344_v49, 6  ;;  %v514_v49 = vld [vmem:[%s816_s0 + $0x19] ss:$0 sm:$0xff] }
 0xae6   :  { %v348_v51 = vadd.f32 %v346_v50, %v765_v10 }
 0xae8   :  { %v526_v52 = vmul.f32 -1.442695, %v348_v51  ;;  %v515_v51 = vld [vmem:[%s816_s0 + $0x1a] ss:$0 sm:$0xff]  ;;  %s650_s0 = smov [#allocation2]  }
 0xae9   :  { %s497_s6 = sshll.u32 %s650_s0, 4  ;;  %s498_s6 = int_to_ptr.vmem [resolvable:$true] %s497_s6 }
 0xaea   :  { %594 = vpow2.f32 %v526_v52  ;;  %s616_s7 = scalar_lea.vmem %s498_s6, 32  ;;  %p621_p1 = scmp.lt.s32.totalorder %s498_s6, %s498_s6 }
 0xaeb   :  { %p617_p0 = scmp.ne.s32.totalorder %s498_s6, %s616_s7  ;;  %p622_p2 = scmp.lt.s32.totalorder %s616_s7, %s616_s7 }
 0xaed   :  { %p623_p3 = por %p622_p2, %p621_p1 }
 0xaef   :  { %p624_p4 = pnand %p623_p3, %p617_p0 }
 0xaf4   :  { %v595_v53 = vpop.eup %594 }
 0xaf5   :  { %v352_v54 = vadd.f32 1.0, %v595_v53 }
 0xaf7   :  { %596 = vrcp.f32 %v352_v54 }
 0xb01   :  { %v597_v55 = vpop.eup %596 }
 0xb02   :  { %v355_v56 = vmul.f32 2.0, %v597_v55  ;;  %v360_v31 = vmul.f32 %v597_v55, %v358_v58 }
 0xb04   :  { %v527_v1 = vadd.f32 -1.0, %v355_v56 }
 0xb06   :  { %362 = vrot.lane.b32.xlu1 %v527_v1, %s645_s24 }
 0xb78   :  { %v363_v3 = vpop.permute.xlu1 %362 }
 0xb79   :  { %v365_v57 = vmul.f32 %v597_v55, %v363_v3 }
 0xb7b   :  { %367 = vrot.lane.b32.xlu1 %v365_v57, %s646_s25 }
 0xbed   :  { %v368_v59 = vpop.permute.xlu1 %367 }
 0xbee   :  { %v370_v60 = vadd.f32 %v368_v59, %v360_v31 }
 0xbf0   :  { %598 = vtanh.f32 %v370_v60  ;;  %v402_v24 = vrot.slane %v370_v60, 6 }
 0xbfa   :  { %v599_v61 = vpop.eup %598 }
 0xbfb   :  { %373 = vrot.lane.b32.xlu0 %v599_v61, %s649_s26 }
 0xc6d   :  { %v374_v62 = vpop.permute.xlu0 %373 }
 0xc6e   :  { %v376_v4 = vmul.f32 %v597_v55, %v374_v62 }
 0xc70   :  { %384 = vperm.xlu0 %560, %v376_v4   ;;  %379 = vperm.xlu1 %559, %v376_v4  }
 0xc74   :  { %561 = vset.pattern.permute.xlu0 %v647_v44  ;;  %562 = vset.pattern.permute.xlu1 %v648_v45 }
 0xcef   :  { %v385_v63 = vpop.permute.xlu0 %384  ;;  %v380_v5 = vpop.permute.xlu1 %379 }
 0xcf0   :  { %v387_v0 = vmul.f32 %v698_v16, %v385_v63  ;;  %v382_v7 = vmul.f32 %v693_v15, %v380_v5 }
 0xcf2   :  { %v388_v8 = vadd.f32 %v387_v0, %v382_v7 }
 0xcf4   :  { %v390_v9 = vrot.slane %v388_v8, 6 }
 0xcf6   :  { %v392_v2 = vadd.f32 %v390_v9, %v765_v10 }
 0xcf8   :  { %v528_v13 = vmul.f32 -1.442695, %v392_v2 }
 0xcfa   :  { %600 = vpow2.f32 %v528_v13 }
 0xd04   :  { %v601_v14 = vpop.eup %600 }
 0xd05   :  { %v396_v17 = vadd.f32 1.0, %v601_v14 }
 0xd07   :  { %602 = vrcp.f32 %v396_v17 }
 0xd11   :  { %v603_v18 = vpop.eup %602 }
 0xd12   :  { %v399_v20 = vmul.f32 2.0, %v603_v18  ;;  %v404_v25 = vmul.f32 %v603_v18, %v402_v24 }
 0xd14   :  { %v529_v44 = vadd.f32 -1.0, %v399_v20 }
 0xd16   :  { %406 = vrot.lane.b32.xlu1 %v529_v44, %s645_s24 }
 0xd88   :  { %v407_v21 = vpop.permute.xlu1 %406 }
 0xd89   :  { %v409_v23 = vmul.f32 %v603_v18, %v407_v21 }
 0xd8b   :  { %411 = vrot.lane.b32.xlu0 %v409_v23, %s646_s25 }
 0xdfd   :  { %v412_v26 = vpop.permute.xlu0 %411 }
 0xdfe   :  { %v414_v6 = vadd.f32 %v412_v26, %v404_v25 }
 0xe00   :  { %604 = vtanh.f32 %v414_v6 }
 0xe0a   :  { %v605_v11 = vpop.eup %604 }
 0xe0b   :  { %417 = vrot.lane.b32.xlu1 %v605_v11, %s649_s26 }
 0xe7d   :  { %v418_v27 = vpop.permute.xlu1 %417 }
 0xe7e   :  { %v420_v28 = vmul.f32 %v603_v18, %v418_v27 }
 0xe80   :  { %428 = vperm.xlu1 %562, %v420_v28   ;;  %423 = vperm.xlu0 %561, %v420_v28  }
 0xeff   :  { %v429_v29 = vpop.permute.xlu1 %428  ;;  %v424_v12 = vpop.permute.xlu0 %423 }
 0xf00   :  { %v431_v30 = vmul.f32 %v698_v16, %v429_v29  ;;  %v426_v32 = vmul.f32 %v693_v15, %v424_v12  ;;  %v446_v16 = vrot.slane %v414_v6, 6 }
 0xf02   :  { %v432_v19 = vadd.f32 %v431_v30, %v426_v32 }
 0xf04   :  { %v434_v33 = vrot.slane %v432_v19, 6 }
 0xf06   :  { %v436_v34 = vadd.f32 %v434_v33, %v765_v10 }
 0xf08   :  { %v530_v22 = vmul.f32 -1.442695, %v436_v34 }
 0xf0a   :  { %606 = vpow2.f32 %v530_v22 }
 0xf14   :  { %v607_v35 = vpop.eup %606 }
 0xf15   :  { %v440_v36 = vadd.f32 1.0, %v607_v35 }
 0xf17   :  { %608 = vrcp.f32 %v440_v36 }
 0xf21   :  { %v609_v37 = vpop.eup %608 }
 0xf22   :  { %v443_v38 = vmul.f32 2.0, %v609_v37  ;;  %v448_v15 = vmul.f32 %v609_v37, %v446_v16 }
 0xf24   :  { %v531_v39 = vadd.f32 -1.0, %v443_v38 }
 0xf26   :  { %450 = vrot.lane.b32.xlu1 %v531_v39, %s645_s24 }
 0xf98   :  { %v451_v40 = vpop.permute.xlu1 %450 }
 0xf99   :  { %v453_v41 = vmul.f32 %v609_v37, %v451_v40 }
 0xf9b   :  { %455 = vrot.lane.b32.xlu0 %v453_v41, %s646_s25 }
0x100d   :  { %v456_v42 = vpop.permute.xlu0 %455 }
0x100e   :  { %v458_v43 = vadd.f32 %v456_v42, %v448_v15 }
0x1010   :  { %610 = vtanh.f32 %v458_v43 }
0x101a   :  { %v611_v10 = vpop.eup %610 }
0x101b   :  { %461 = vrot.lane.b32.xlu1 %v611_v10, %s649_s26 }
0x108d   :  { %v462_v46 = vpop.permute.xlu1 %461 }
0x108e   :  { %v464_v47 = vmul.f32 %v609_v37, %v462_v46 }
0x1090   :  { %473 = vperm.xlu1 %562, %v464_v47   ;;  %467 = vperm.xlu0 %561, %v464_v47  }
0x1094   :  { %563 = vset.pattern.permute.xlu0 %v648_v45 }
0x110f   :  { %v474_v50 = vpop.permute.xlu1 %473  ;;  %v468_v52 = vpop.permute.xlu0 %467 }
0x1110   :  { %v470_v53 = vmul.f32 %v513_v48, %v468_v52  ;;  %v476_v54 = vmul.f32 %v514_v49, %v474_v50 }
0x1112   :  { %v471_v55 = vadd.f32 %v515_v51, %v470_v53 }
0x1114   :  { %v477_v56 = vadd.f32 %v476_v54, %v471_v55 }
0x1116   :  { %v479_v45 = vsel %vm478_vm0, %v477_v56, -inf }
0x1117   :  { %480 = vmax.xlane.f32.xlu0 %v479_v45 }
0x11a4   :  { %v481_v1 = vpop.xlane.xlu0 %480 }
0x11a5   :  { %v482_v3 = vsub.f32 %v477_v56, %v481_v1 }
0x11a7   :  { %v483_v57 = vmul.f32 1.442695, %v482_v3 }
0x11a9   :  { %612 = vpow2.f32 %v483_v57 }
0x11b3   :  { %v613_v58 = vpop.eup %612 }
0x11b4   :  { %v485_v31 = vsel %vm478_vm0, %v613_v58, 0.0 }
0x11b5   :  { %486 = vadd.xlane.f32.xlu1 %v485_v31 }
0x1242   :  { %v487_v59 = vpop.xlane.xlu1 %486 }
0x1243   :  { %614 = vrcp.f32 %v487_v59 }
0x124d   :  { %v615_v60 = vpop.eup %614 }
0x124e   :  { %v489_v61 = vmul.f32 %v615_v60, %v613_v58 }
0x1250   :  { %490 = vst.msk [vmem:[#allocation2 - $0x6] sm:$0xc0] %vm478_vm0, %v489_v61 }
0x1251   :  { %627 = shalt.err (!%p624_p4)
}
0x1252   :  { %s628_s10 = scalar_lea.hbm %s817_s1, 32 }
0x1253   :  { %p629_p5 = scmp.ne.s32.totalorder %s817_s1, %s628_s10  ;;  %p632_p6 = scmp.lt.u32.totalorder %s628_s10, %s817_s1 }
0x1255   :  { %p634_p7 = pnand %p632_p6, %p629_p5 }
0x1257   :  { %637 = shalt.err (!%p634_p7)
}
0x1258   :  { %500 = dma.vmem_to_hbm [thread:$0]  %s498_s6, 32, %s817_s1, [#allocation3]  }
0x1259   :  { %638 = dma.done.wait [#allocation3], 32  }
0x125a   :  { %639 = vsyncadd [#allocation3], 4294967264 }
0x125b   :  { %504 = vsyncpa [#allocation3], 1 }

</bundles_post_ra>
